<compile_context>
chip_gen: v7x
topology: tpu7x:2x2x1
jax: 0.10.0
libtpu: 0.0.40
codegen_flags: <defaults>
</compile_context>

<pallas_src>
import functools
import math

import jax
import jax.numpy as jnp
import numpy as np
from jax import lax
from jax.experimental import pallas as pl
from jax.experimental.pallas import tpu as pltpu


# ----------------------------- kernel --------------------------------------


def _layernorm(x, g, b, eps=1e-5):
    mu = jnp.mean(x, axis=-1, keepdims=True)
    var = jnp.mean(jnp.square(x - mu), axis=-1, keepdims=True)
    return (x - mu) * lax.rsqrt(var + eps) * g + b


def _fused_encoder_kernel(x0_ref, mask_ref, wqkv_ref, wo_ref, w1_ref, w2_ref,
                          vecs_ref, out_ref, *, hid_dim, n_heads, head_dim,
                          pf_dim):
    H = hid_dim
    layer = pl.program_id(1)

    # Load the embedded activations of this batch element into the
    # VMEM-resident output block once (at layer 0 of each batch element).
    @pl.when(layer == 0)
    def _():
        out_ref[...] = x0_ref[...]

    x = out_ref[...]                                   # (S, H) f32, resident
    xb = x.astype(jnp.bfloat16)

    def vec(row, size):                                # packed per-layer vectors
        return vecs_ref[row:row + 1, :size]            # (1, size) — static slice

    # ---- fused QKV projection: one full-width MXU push (N = 3H) ------------
    # (1/sqrt(dh) is already folded into the Wq/bq columns in the wrapper.)
    qkv = jnp.dot(xb, wqkv_ref[...],
                  preferred_element_type=jnp.float32) + vec(0, 3 * H)

    mask = mask_ref[...]                               # (1, S) key mask (0/1)

    # ---- attention, per head (static unrolled loop; K=dh is inherent) ------
    ctx_parts = []
    for n in range(n_heads):
        o = n * head_dim
        q = qkv[:, o:o + head_dim].astype(jnp.bfloat16)             # (S, dh)
        k = qkv[:, H + o:H + o + head_dim].astype(jnp.bfloat16)
        v = qkv[:, 2 * H + o:2 * H + o + head_dim].astype(jnp.bfloat16)

        e = lax.dot_general(q, k, (((1,), (1,)), ((), ())),
                            preferred_element_type=jnp.float32)     # (S, S)
        e = jnp.where(mask == 0.0, -1e10, e)           # masked_fill semantics
        p = jnp.exp(e - jnp.max(e, axis=-1, keepdims=True))         # EUP
        ctx = jnp.dot(p.astype(jnp.bfloat16), v,
                      preferred_element_type=jnp.float32)           # (S, dh)
        # deferred softmax normalization: scale (S,dh) instead of (S,S)
        ctx = ctx * pl.reciprocal(jnp.sum(p, axis=-1, keepdims=True),
                                  approx=True)
        ctx_parts.append(ctx)

    # concat heads along lanes -> (S, H); single K=H output projection.
    ctx_all = jnp.concatenate(ctx_parts, axis=-1).astype(jnp.bfloat16)
    attn = jnp.dot(ctx_all, wo_ref[...],
                   preferred_element_type=jnp.float32) + vec(1, H)

    # residual + LayerNorm (dropout = identity, eval mode)
    y = _layernorm(x + attn, vec(2, H), vec(3, H))

    # ---- position-wise feed-forward ----
    yb = y.astype(jnp.bfloat16)
    h1 = jnp.maximum(
        jnp.dot(yb, w1_ref[...], preferred_element_type=jnp.float32)
        + vec(4, pf_dim), 0.0)
    ffn = jnp.dot(h1.astype(jnp.bfloat16), w2_ref[...],
                  preferred_element_type=jnp.float32) + vec(5, H)

    out_ref[...] = _layernorm(y + ffn, vec(6, H), vec(7, H))


# ----------------------------- wrappers -------------------------------------


def _stack_layer_params(layers, n_heads):
    """Stack per-layer params on a leading layer axis in kernel-friendly layouts:
    fused lane-dense (H,3H) QKV weight with 1/sqrt(dh) folded into the Q columns,
    lane-dense bf16 matmul weights, and all small per-layer vectors packed into
    one (L, 8, max_dim) f32 tensor (one DMA stream per layer)."""
    H = layers[0]["wq"].shape[0]
    pf = layers[0]["w1"].shape[1]
    dh = H // n_heads
    inv_scale = 1.0 / math.sqrt(dh)
    bf16 = jnp.bfloat16

    def stk(name):
        return jnp.stack([lp[name] for lp in layers], axis=0)

    wqkv = jnp.concatenate([stk("wq") * inv_scale, stk("wk"), stk("wv")],
                           axis=2).astype(bf16)                     # (L, H, 3H)
    bqkv = jnp.concatenate([stk("bq") * inv_scale, stk("bk"), stk("bv")],
                           axis=2)                                  # (L, 1, 3H)

    maxd = max(3 * H, pf)

    def pad(v):                                # (L, 1, n) -> (L, 1, maxd)
        return jnp.pad(v, ((0, 0), (0, 0), (0, maxd - v.shape[2])))

    vecs = jnp.concatenate(
        [pad(bqkv), pad(stk("bo")), pad(stk("ln1g")), pad(stk("ln1b")),
         pad(stk("b1")), pad(stk("b2")), pad(stk("ln2g")), pad(stk("ln2b"))],
        axis=1).astype(jnp.float32)                                 # (L, 8, maxd)

    return dict(wqkv=wqkv, wo=stk("wo").astype(bf16),
                w1=stk("w1").astype(bf16), w2=stk("w2").astype(bf16),
                vecs=vecs)


def fused_encoder_pallas(x0, mask_f, sp, *, batch, seq, hid_dim, n_heads,
                         pf_dim, n_layers):
    dh = hid_dim // n_heads
    maxd = sp["vecs"].shape[2]

    kernel = functools.partial(_fused_encoder_kernel, hid_dim=hid_dim,
                               n_heads=n_heads, head_dim=dh, pf_dim=pf_dim)

    def per_batch(*tail):                      # block follows the batch axis
        n = len(tail)
        return pl.BlockSpec((None,) + tail, lambda b, l, n=n: (b,) + (0,) * n)

    def per_layer(*tail):                      # block streamed per layer
        n = len(tail)
        return pl.BlockSpec((None,) + tail, lambda b, l, n=n: (l,) + (0,) * n)

    in_specs = [
        per_batch(seq, hid_dim),               # x0          (B, S, H)   f32
        per_batch(1, seq),                     # key mask    (B, 1, S)   f32
        per_layer(hid_dim, 3 * hid_dim),       # Wqkv        (L, H, 3H)  bf16
        per_layer(hid_dim, hid_dim),           # Wo          (L, H, H)   bf16
        per_layer(hid_dim, pf_dim),            # W1          (L, H, pf)  bf16
        per_layer(pf_dim, hid_dim),            # W2          (L, pf, H)  bf16
        per_layer(8, maxd),                    # packed per-layer vectors f32
    ]

    flops = batch * n_layers * (
        2 * seq * hid_dim * 3 * hid_dim            # QKV
        + 4 * n_heads * seq * seq * dh             # scores + PV
        + 2 * seq * hid_dim * hid_dim              # out projection
        + 4 * seq * hid_dim * pf_dim)              # FFN
    transcendentals = batch * n_layers * n_heads * seq * seq
    bytes_accessed = (
        4 * batch * seq * hid_dim * 2 + 4 * batch * seq
        + batch * n_layers * (2 * (3 * hid_dim * hid_dim + hid_dim * hid_dim
                                   + 2 * hid_dim * pf_dim) + 4 * 8 * maxd))

    return pl.pallas_call(
        kernel,
        out_shape=jax.ShapeDtypeStruct((batch, seq, hid_dim), jnp.float32),
        grid=(batch, n_layers),
        in_specs=in_specs,
        out_specs=per_batch(seq, hid_dim),     # same block across layers -> resident
        compiler_params=pltpu.CompilerParams(
            dimension_semantics=("parallel", "arbitrary"),
            vmem_limit_bytes=32 * 1024 * 1024),
        cost_estimate=pl.CostEstimate(flops=flops,
                                      transcendentals=transcendentals,
                                      bytes_accessed=bytes_accessed),
    )(x0, mask_f, sp["wqkv"], sp["wo"], sp["w1"], sp["w2"], sp["vecs"])


def transformer_encoder_forward(src, key_pad_mask, params, n_heads, mask_key):
    """Replicates TransformerEncoder.forward (eval-mode dropout)."""
    B, S, H = src.shape
    n_layers = len(params["layers"])
    pf_dim = params["layers"][0]["w1"].shape[1]

    # _make_src_mask: bernoulli(0.7) & key_pad_mask -> byte mask (B, 1, 1, S)
    bern = jax.random.bernoulli(mask_key, 0.7, (B, 1, 1, S)).astype(jnp.uint8)
    src_mask = jnp.bitwise_and(bern, key_pad_mask.astype(jnp.uint8))

    # src*sqrt(H) + pos_embedding (dropout = identity); trivial elementwise op
    # left to XLA in the wrapper.
    pos_emb = params["pos_embedding"][:S]                            # (S, H)
    x0 = (src * math.sqrt(float(H)) + pos_emb[None]).astype(jnp.float32)

    # key-padding mask as a per-batch (B, 1, S) 0/1 f32 tensor for the kernel.
    mask_f = src_mask[:, 0, :, :].astype(jnp.float32)                # (B, 1, S)

    sp = _stack_layer_params(params["layers"], n_heads)
    out = fused_encoder_pallas(x0, mask_f, sp, batch=B, seq=S, hid_dim=H,
                               n_heads=n_heads, pf_dim=pf_dim,
                               n_layers=n_layers)
    return out, src_mask

# TODO(synk): training-mode dropout (RNG inside the kernel) is not implemented;
# eval-mode identity only.


# ----------------------------- params / reference ---------------------------


def init_params(key, hid_dim, n_layers, pf_dim, max_length):
    def dense(k, i, o, s=0.05):
        kw, kb = jax.random.split(k)
        return (jax.random.normal(kw, (i, o), jnp.float32) * s,
                jax.random.normal(kb, (1, o), jnp.float32) * s)

    keys = jax.random.split(key, n_layers + 1)
    pos_emb = jax.random.normal(keys[0], (max_length, hid_dim), jnp.float32) * 0.05
    layers = []
    for li in range(n_layers):
        ks = jax.random.split(keys[li + 1], 6)
        wq, bq = dense(ks[0], hid_dim, hid_dim)
        wk, bk = dense(ks[1], hid_dim, hid_dim)
        wv, bv = dense(ks[2], hid_dim, hid_dim)
        wo, bo = dense(ks[3], hid_dim, hid_dim)
        w1, b1 = dense(ks[4], hid_dim, pf_dim)
        w2, b2 = dense(ks[5], pf_dim, hid_dim)
        layers.append(dict(
            wq=wq, bq=bq, wk=wk, bk=bk, wv=wv, bv=bv, wo=wo, bo=bo,
            ln1g=jnp.ones((1, hid_dim), jnp.float32),
            ln1b=jnp.zeros((1, hid_dim), jnp.float32),
            w1=w1, b1=b1, w2=w2, b2=b2,
            ln2g=jnp.ones((1, hid_dim), jnp.float32),
            ln2b=jnp.zeros((1, hid_dim), jnp.float32)))
    return dict(pos_embedding=pos_emb, layers=layers)


def reference_forward(src, mask_f, params, n_heads):
    """Pure-JAX f32 reference (same math, no Pallas) for validation."""
    B, S, H = src.shape
    dh = H // n_heads

    def ln(z, g, b):
        mu = z.mean(-1, keepdims=True)
        var = ((z - mu) ** 2).mean(-1, keepdims=True)
        return (z - mu) / jnp.sqrt(var + 1e-5) * g + b

    x = src * math.sqrt(float(H)) + params["pos_embedding"][:S][None]
    m = mask_f[:, None, :, :]                                   # (B, 1, 1, S)
    for p in params["layers"]:
        q = (x @ p["wq"] + p["bq"]).reshape(B, S, n_heads, dh).transpose(0, 2, 1, 3)
        k = (x @ p["wk"] + p["bk"]).reshape(B, S, n_heads, dh).transpose(0, 2, 1, 3)
        v = (x @ p["wv"] + p["bv"]).reshape(B, S, n_heads, dh).transpose(0, 2, 1, 3)
        e = jnp.einsum("bhqd,bhkd->bhqk", q, k) / math.sqrt(dh)
        e = jnp.where(m == 0.0, -1e10, e)
        a = jax.nn.softmax(e, axis=-1)
        ctx = jnp.einsum("bhqk,bhkd->bhqd", a, v).transpose(0, 2, 1, 3).reshape(B, S, H)
        attn = ctx @ p["wo"] + p["bo"]
        y = ln(x + attn, p["ln1g"], p["ln1b"])
        h1 = jnp.maximum(y @ p["w1"] + p["b1"], 0.0)
        ffn = h1 @ p["w2"] + p["b2"]
        x = ln(y + ffn, p["ln2g"], p["ln2b"])
    return x


# ----------------------------- main ----------------------------------------


if __name__ == "__main__":
    B, S, H = 2, 8, 32          # batch, seq, hid_dim
    N_HEADS, PF_DIM, N_LAYERS = 4, 64, 2
    MAX_LEN = 100

    root = jax.random.PRNGKey(0)
    k_param, k_src, k_pad, k_mask = jax.random.split(root, 4)

    params = init_params(k_param, H, N_LAYERS, PF_DIM, MAX_LEN)
    src = jax.random.normal(k_src, (B, S, H), jnp.float32)
    key_pad_mask = (jax.random.uniform(k_pad, (B, 1, 1, S)) < 0.9).astype(jnp.uint8)

    out, src_mask = transformer_encoder_forward(src, key_pad_mask, params,
                                                N_HEADS, k_mask)
    out = jax.block_until_ready(out)
    src_mask = jax.block_until_ready(src_mask)

    # validate against pure-JAX f32 reference (kernel matmuls run in bf16)
    mask_f = src_mask[:, 0, :, :].astype(jnp.float32)
    with jax.default_matmul_precision("highest"):
        ref = reference_forward(src, mask_f, params, N_HEADS)
    np.testing.assert_allclose(np.asarray(out), np.asarray(ref),
                               rtol=5e-2, atol=5e-2)

    print("KERNEL_OK")
</pallas_src>

<mosaic_0001>
module attributes {stable_mosaic.version = 11 : i64} {
  func.func @_fused_encoder_kernel(%arg0: i32, %arg1: i32, %arg2: memref<1x8x32xf32, #tpu.memory_space<vmem>>, %arg3: memref<1x1x8xf32, #tpu.memory_space<vmem>>, %arg4: memref<1x32x96xbf16, #tpu.memory_space<vmem>>, %arg5: memref<1x32x32xbf16, #tpu.memory_space<vmem>>, %arg6: memref<1x32x64xbf16, #tpu.memory_space<vmem>>, %arg7: memref<1x64x32xbf16, #tpu.memory_space<vmem>>, %arg8: memref<1x8x96xf32, #tpu.memory_space<vmem>>, %arg9: memref<1x8x32xf32, #tpu.memory_space<vmem>>) attributes {dimension_semantics = [#tpu.dimension_semantics<parallel>, #tpu.dimension_semantics<arbitrary>], iteration_bounds = array<i64: 2, 2>, scalar_prefetch = 0 : i64, scratch_operands = 0 : i64, tpu.core_type = #tpu.core_type<tc>, window_params = [{transform_indices = @transform_0, window_bounds = array<i64: 1, 8, 32>}, {transform_indices = @transform_1, window_bounds = array<i64: 1, 1, 8>}, {transform_indices = @transform_2, window_bounds = array<i64: 1, 32, 96>}, {transform_indices = @transform_3, window_bounds = array<i64: 1, 32, 32>}, {transform_indices = @transform_4, window_bounds = array<i64: 1, 32, 64>}, {transform_indices = @transform_5, window_bounds = array<i64: 1, 64, 32>}, {transform_indices = @transform_6, window_bounds = array<i64: 1, 8, 96>}, {transform_indices = @transform_7, window_bounds = array<i64: 1, 8, 32>}]} {
    %c0_i32 = arith.constant 0 : i32
    %0 = arith.cmpi eq, %arg1, %c0_i32 : i32
    %1 = arith.extui %0 : i1 to i32
    %c0_i32_0 = arith.constant 0 : i32
    %2 = arith.cmpi ne, %1, %c0_i32_0 : i32
    scf.if %2 {
      %c0_76 = arith.constant 0 : index
      %c0_77 = arith.constant 0 : index
      %c0_78 = arith.constant 0 : index
      %199 = vector.load %arg2[%c0_76, %c0_77, %c0_78] : memref<1x8x32xf32, #tpu.memory_space<vmem>>, vector<1x8x32xf32>
      %200 = vector.shape_cast %199 : vector<1x8x32xf32> to vector<8x32xf32>
      %c0_79 = arith.constant 0 : index
      %c0_80 = arith.constant 0 : index
      %c0_81 = arith.constant 0 : index
      %201 = vector.load %arg9[%c0_79, %c0_80, %c0_81] : memref<1x8x32xf32, #tpu.memory_space<vmem>>, vector<1x8x32xf32>
      %202 = vector.shape_cast %201 : vector<1x8x32xf32> to vector<8x32xf32>
      %203 = vector.shape_cast %200 : vector<8x32xf32> to vector<1x8x32xf32>
      tpu.vector_store %arg9[%c0_79, %c0_80, %c0_81], %203 {strides = array<i32>} : memref<1x8x32xf32, #tpu.memory_space<vmem>>, vector<1x8x32xf32>,
    } else {
    }
    %c0 = arith.constant 0 : index
    %c0_1 = arith.constant 0 : index
    %c0_2 = arith.constant 0 : index
    %3 = vector.load %arg9[%c0, %c0_1, %c0_2] : memref<1x8x32xf32, #tpu.memory_space<vmem>>, vector<1x8x32xf32>
    %4 = vector.shape_cast %3 : vector<1x8x32xf32> to vector<8x32xf32>
    %5 = arith.truncf %4 : vector<8x32xf32> to vector<8x32xbf16>
    %c0_3 = arith.constant 0 : index
    %c0_4 = arith.constant 0 : index
    %c0_5 = arith.constant 0 : index
    %6 = vector.load %arg4[%c0_3, %c0_4, %c0_5] : memref<1x32x96xbf16, #tpu.memory_space<vmem>>, vector<1x32x96xbf16>
    %7 = vector.shape_cast %6 : vector<1x32x96xbf16> to vector<32x96xbf16>
    %cst = arith.constant dense<0.000000e+00> : vector<8x96xf32>
    %8 = tpu.matmul %5, %7, %cst {dimension_numbers = #tpu.dot_dimension_numbers<[1], [0], [0], [1], [0, 0, 1, 1], [], []>} : vector<8x32xbf16>, vector<32x96xbf16>, vector<8x96xf32> -> vector<8x96xf32>
    %c0_6 = arith.constant 0 : index
    %c0_7 = arith.constant 0 : index
    %c0_8 = arith.constant 0 : index
    %9 = vector.load %arg8[%c0_6, %c0_7, %c0_8] : memref<1x8x96xf32, #tpu.memory_space<vmem>>, vector<1x1x96xf32>
    %10 = vector.shape_cast %9 : vector<1x1x96xf32> to vector<1x96xf32>
    %11 = vector.broadcast %10 : vector<1x96xf32> to vector<8x96xf32>
    %12 = arith.addf %8, %11 : vector<8x96xf32>
    %c0_9 = arith.constant 0 : index
    %c0_10 = arith.constant 0 : index
    %c0_11 = arith.constant 0 : index
    %13 = vector.load %arg3[%c0_9, %c0_10, %c0_11] : memref<1x1x8xf32, #tpu.memory_space<vmem>>, vector<1x1x8xf32>
    %14 = vector.shape_cast %13 : vector<1x1x8xf32> to vector<1x8xf32>
    %15 = vector.extract_strided_slice %12 {offsets = [0, 0], sizes = [8, 8], strides = [1, 1]} : vector<8x96xf32> to vector<8x8xf32>
    %16 = arith.truncf %15 : vector<8x8xf32> to vector<8x8xbf16>
    %17 = vector.extract_strided_slice %12 {offsets = [0, 32], sizes = [8, 8], strides = [1, 1]} : vector<8x96xf32> to vector<8x8xf32>
    %18 = arith.truncf %17 : vector<8x8xf32> to vector<8x8xbf16>
    %19 = vector.extract_strided_slice %12 {offsets = [0, 64], sizes = [8, 8], strides = [1, 1]} : vector<8x96xf32> to vector<8x8xf32>
    %20 = arith.truncf %19 : vector<8x8xf32> to vector<8x8xbf16>
    %cst_12 = arith.constant dense<0.000000e+00> : vector<8x8xf32>
    %21 = tpu.matmul %16, %18, %cst_12 {dimension_numbers = #tpu.dot_dimension_numbers<[1], [1], [0], [0], [0, 0, 1, 0], [], []>} : vector<8x8xbf16>, vector<8x8xbf16>, vector<8x8xf32> -> vector<8x8xf32>
    %cst_13 = arith.constant 0.000000e+00 : f32
    %22 = vector.broadcast %cst_13 : f32 to vector<1x8xf32>
    %23 = arith.cmpf oeq, %14, %22 : vector<1x8xf32>
    %cst_14 = arith.constant -1.000000e+10 : f32
    %24 = vector.shape_cast %23 : vector<1x8xi1> to vector<1x8xi1>
    %25 = vector.broadcast %24 : vector<1x8xi1> to vector<8x8xi1>
    %26 = vector.broadcast %cst_14 : f32 to vector<8x8xf32>
    %27 = arith.select %25, %26, %21 : vector<8x8xi1>, vector<8x8xf32>
    %cst_15 = arith.constant dense<0xFF800000> : vector<8xf32>
    %28 = vector.multi_reduction <maximumf>, %27, %cst_15 [1] : vector<8x8xf32> to vector<8xf32>
    %29 = vector.shape_cast %28 : vector<8xf32> to vector<8x1xf32>
    %30 = vector.broadcast %29 : vector<8x1xf32> to vector<8x8xf32>
    %31 = arith.subf %27, %30 : vector<8x8xf32>
    %32 = math.exp %31 : vector<8x8xf32>
    %33 = arith.truncf %32 : vector<8x8xf32> to vector<8x8xbf16>
    %cst_16 = arith.constant dense<0.000000e+00> : vector<8x8xf32>
    %34 = tpu.matmul %33, %20, %cst_16 {dimension_numbers = #tpu.dot_dimension_numbers<[1], [0], [0], [1], [0, 0, 1, 1], [], []>} : vector<8x8xbf16>, vector<8x8xbf16>, vector<8x8xf32> -> vector<8x8xf32>
    %cst_17 = arith.constant dense<0.000000e+00> : vector<8xf32>
    %35 = vector.multi_reduction <add>, %32, %cst_17 [1] : vector<8x8xf32> to vector<8xf32>
    %36 = vector.shape_cast %35 : vector<8xf32> to vector<8x1xf32>
    %37 = tpu.reciprocal %36 {approx = true} : vector<8x1xf32> -> vector<8x1xf32>
    %38 = vector.broadcast %37 : vector<8x1xf32> to vector<8x8xf32>
    %39 = arith.mulf %34, %38 : vector<8x8xf32>
    %40 = vector.extract_strided_slice %12 {offsets = [0, 8], sizes = [8, 8], strides = [1, 1]} : vector<8x96xf32> to vector<8x8xf32>
    %41 = arith.truncf %40 : vector<8x8xf32> to vector<8x8xbf16>
    %42 = vector.extract_strided_slice %12 {offsets = [0, 40], sizes = [8, 8], strides = [1, 1]} : vector<8x96xf32> to vector<8x8xf32>
    %43 = arith.truncf %42 : vector<8x8xf32> to vector<8x8xbf16>
    %44 = vector.extract_strided_slice %12 {offsets = [0, 72], sizes = [8, 8], strides = [1, 1]} : vector<8x96xf32> to vector<8x8xf32>
    %45 = arith.truncf %44 : vector<8x8xf32> to vector<8x8xbf16>
    %cst_18 = arith.constant dense<0.000000e+00> : vector<8x8xf32>
    %46 = tpu.matmul %41, %43, %cst_18 {dimension_numbers = #tpu.dot_dimension_numbers<[1], [1], [0], [0], [0, 0, 1, 0], [], []>} : vector<8x8xbf16>, vector<8x8xbf16>, vector<8x8xf32> -> vector<8x8xf32>
    %cst_19 = arith.constant 0.000000e+00 : f32
    %47 = vector.broadcast %cst_19 : f32 to vector<1x8xf32>
    %48 = arith.cmpf oeq, %14, %47 : vector<1x8xf32>
    %cst_20 = arith.constant -1.000000e+10 : f32
    %49 = vector.shape_cast %48 : vector<1x8xi1> to vector<1x8xi1>
    %50 = vector.broadcast %49 : vector<1x8xi1> to vector<8x8xi1>
    %51 = vector.broadcast %cst_20 : f32 to vector<8x8xf32>
    %52 = arith.select %50, %51, %46 : vector<8x8xi1>, vector<8x8xf32>
    %cst_21 = arith.constant dense<0xFF800000> : vector<8xf32>
    %53 = vector.multi_reduction <maximumf>, %52, %cst_21 [1] : vector<8x8xf32> to vector<8xf32>
    %54 = vector.shape_cast %53 : vector<8xf32> to vector<8x1xf32>
    %55 = vector.broadcast %54 : vector<8x1xf32> to vector<8x8xf32>
    %56 = arith.subf %52, %55 : vector<8x8xf32>
    %57 = math.exp %56 : vector<8x8xf32>
    %58 = arith.truncf %57 : vector<8x8xf32> to vector<8x8xbf16>
    %cst_22 = arith.constant dense<0.000000e+00> : vector<8x8xf32>
    %59 = tpu.matmul %58, %45, %cst_22 {dimension_numbers = #tpu.dot_dimension_numbers<[1], [0], [0], [1], [0, 0, 1, 1], [], []>} : vector<8x8xbf16>, vector<8x8xbf16>, vector<8x8xf32> -> vector<8x8xf32>
    %cst_23 = arith.constant dense<0.000000e+00> : vector<8xf32>
    %60 = vector.multi_reduction <add>, %57, %cst_23 [1] : vector<8x8xf32> to vector<8xf32>
    %61 = vector.shape_cast %60 : vector<8xf32> to vector<8x1xf32>
    %62 = tpu.reciprocal %61 {approx = true} : vector<8x1xf32> -> vector<8x1xf32>
    %63 = vector.broadcast %62 : vector<8x1xf32> to vector<8x8xf32>
    %64 = arith.mulf %59, %63 : vector<8x8xf32>
    %65 = vector.extract_strided_slice %12 {offsets = [0, 16], sizes = [8, 8], strides = [1, 1]} : vector<8x96xf32> to vector<8x8xf32>
    %66 = arith.truncf %65 : vector<8x8xf32> to vector<8x8xbf16>
    %67 = vector.extract_strided_slice %12 {offsets = [0, 48], sizes = [8, 8], strides = [1, 1]} : vector<8x96xf32> to vector<8x8xf32>
    %68 = arith.truncf %67 : vector<8x8xf32> to vector<8x8xbf16>
    %69 = vector.extract_strided_slice %12 {offsets = [0, 80], sizes = [8, 8], strides = [1, 1]} : vector<8x96xf32> to vector<8x8xf32>
    %70 = arith.truncf %69 : vector<8x8xf32> to vector<8x8xbf16>
    %cst_24 = arith.constant dense<0.000000e+00> : vector<8x8xf32>
    %71 = tpu.matmul %66, %68, %cst_24 {dimension_numbers = #tpu.dot_dimension_numbers<[1], [1], [0], [0], [0, 0, 1, 0], [], []>} : vector<8x8xbf16>, vector<8x8xbf16>, vector<8x8xf32> -> vector<8x8xf32>
    %cst_25 = arith.constant 0.000000e+00 : f32
    %72 = vector.broadcast %cst_25 : f32 to vector<1x8xf32>
    %73 = arith.cmpf oeq, %14, %72 : vector<1x8xf32>
    %cst_26 = arith.constant -1.000000e+10 : f32
    %74 = vector.shape_cast %73 : vector<1x8xi1> to vector<1x8xi1>
    %75 = vector.broadcast %74 : vector<1x8xi1> to vector<8x8xi1>
    %76 = vector.broadcast %cst_26 : f32 to vector<8x8xf32>
    %77 = arith.select %75, %76, %71 : vector<8x8xi1>, vector<8x8xf32>
    %cst_27 = arith.constant dense<0xFF800000> : vector<8xf32>
    %78 = vector.multi_reduction <maximumf>, %77, %cst_27 [1] : vector<8x8xf32> to vector<8xf32>
    %79 = vector.shape_cast %78 : vector<8xf32> to vector<8x1xf32>
    %80 = vector.broadcast %79 : vector<8x1xf32> to vector<8x8xf32>
    %81 = arith.subf %77, %80 : vector<8x8xf32>
    %82 = math.exp %81 : vector<8x8xf32>
    %83 = arith.truncf %82 : vector<8x8xf32> to vector<8x8xbf16>
    %cst_28 = arith.constant dense<0.000000e+00> : vector<8x8xf32>
    %84 = tpu.matmul %83, %70, %cst_28 {dimension_numbers = #tpu.dot_dimension_numbers<[1], [0], [0], [1], [0, 0, 1, 1], [], []>} : vector<8x8xbf16>, vector<8x8xbf16>, vector<8x8xf32> -> vector<8x8xf32>
    %cst_29 = arith.constant dense<0.000000e+00> : vector<8xf32>
    %85 = vector.multi_reduction <add>, %82, %cst_29 [1] : vector<8x8xf32> to vector<8xf32>
    %86 = vector.shape_cast %85 : vector<8xf32> to vector<8x1xf32>
    %87 = tpu.reciprocal %86 {approx = true} : vector<8x1xf32> -> vector<8x1xf32>
    %88 = vector.broadcast %87 : vector<8x1xf32> to vector<8x8xf32>
    %89 = arith.mulf %84, %88 : vector<8x8xf32>
    %90 = vector.extract_strided_slice %12 {offsets = [0, 24], sizes = [8, 8], strides = [1, 1]} : vector<8x96xf32> to vector<8x8xf32>
    %91 = arith.truncf %90 : vector<8x8xf32> to vector<8x8xbf16>
    %92 = vector.extract_strided_slice %12 {offsets = [0, 56], sizes = [8, 8], strides = [1, 1]} : vector<8x96xf32> to vector<8x8xf32>
    %93 = arith.truncf %92 : vector<8x8xf32> to vector<8x8xbf16>
    %94 = vector.extract_strided_slice %12 {offsets = [0, 88], sizes = [8, 8], strides = [1, 1]} : vector<8x96xf32> to vector<8x8xf32>
    %95 = arith.truncf %94 : vector<8x8xf32> to vector<8x8xbf16>
    %cst_30 = arith.constant dense<0.000000e+00> : vector<8x8xf32>
    %96 = tpu.matmul %91, %93, %cst_30 {dimension_numbers = #tpu.dot_dimension_numbers<[1], [1], [0], [0], [0, 0, 1, 0], [], []>} : vector<8x8xbf16>, vector<8x8xbf16>, vector<8x8xf32> -> vector<8x8xf32>
    %cst_31 = arith.constant 0.000000e+00 : f32
    %97 = vector.broadcast %cst_31 : f32 to vector<1x8xf32>
    %98 = arith.cmpf oeq, %14, %97 : vector<1x8xf32>
    %cst_32 = arith.constant -1.000000e+10 : f32
    %99 = vector.shape_cast %98 : vector<1x8xi1> to vector<1x8xi1>
    %100 = vector.broadcast %99 : vector<1x8xi1> to vector<8x8xi1>
    %101 = vector.broadcast %cst_32 : f32 to vector<8x8xf32>
    %102 = arith.select %100, %101, %96 : vector<8x8xi1>, vector<8x8xf32>
    %cst_33 = arith.constant dense<0xFF800000> : vector<8xf32>
    %103 = vector.multi_reduction <maximumf>, %102, %cst_33 [1] : vector<8x8xf32> to vector<8xf32>
    %104 = vector.shape_cast %103 : vector<8xf32> to vector<8x1xf32>
    %105 = vector.broadcast %104 : vector<8x1xf32> to vector<8x8xf32>
    %106 = arith.subf %102, %105 : vector<8x8xf32>
    %107 = math.exp %106 : vector<8x8xf32>
    %108 = arith.truncf %107 : vector<8x8xf32> to vector<8x8xbf16>
    %cst_34 = arith.constant dense<0.000000e+00> : vector<8x8xf32>
    %109 = tpu.matmul %108, %95, %cst_34 {dimension_numbers = #tpu.dot_dimension_numbers<[1], [0], [0], [1], [0, 0, 1, 1], [], []>} : vector<8x8xbf16>, vector<8x8xbf16>, vector<8x8xf32> -> vector<8x8xf32>
    %cst_35 = arith.constant dense<0.000000e+00> : vector<8xf32>
    %110 = vector.multi_reduction <add>, %107, %cst_35 [1] : vector<8x8xf32> to vector<8xf32>
    %111 = vector.shape_cast %110 : vector<8xf32> to vector<8x1xf32>
    %112 = tpu.reciprocal %111 {approx = true} : vector<8x1xf32> -> vector<8x1xf32>
    %113 = vector.broadcast %112 : vector<8x1xf32> to vector<8x8xf32>
    %114 = arith.mulf %109, %113 : vector<8x8xf32>
    %115 = tpu.concatenate %39, %64, %89, %114 in 1 : vector<8x8xf32>, vector<8x8xf32>, vector<8x8xf32>, vector<8x8xf32> -> vector<8x32xf32>
    %116 = arith.truncf %115 : vector<8x32xf32> to vector<8x32xbf16>
    %c0_36 = arith.constant 0 : index
    %c0_37 = arith.constant 0 : index
    %c0_38 = arith.constant 0 : index
    %117 = vector.load %arg5[%c0_36, %c0_37, %c0_38] : memref<1x32x32xbf16, #tpu.memory_space<vmem>>, vector<1x32x32xbf16>
    %118 = vector.shape_cast %117 : vector<1x32x32xbf16> to vector<32x32xbf16>
    %cst_39 = arith.constant dense<0.000000e+00> : vector<8x32xf32>
    %119 = tpu.matmul %116, %118, %cst_39 {dimension_numbers = #tpu.dot_dimension_numbers<[1], [0], [0], [1], [0, 0, 1, 1], [], []>} : vector<8x32xbf16>, vector<32x32xbf16>, vector<8x32xf32> -> vector<8x32xf32>
    %c0_40 = arith.constant 0 : index
    %c1 = arith.constant 1 : index
    %c0_41 = arith.constant 0 : index
    %120 = vector.load %arg8[%c0_40, %c1, %c0_41] : memref<1x8x96xf32, #tpu.memory_space<vmem>>, vector<1x1x32xf32>
    %121 = vector.shape_cast %120 : vector<1x1x32xf32> to vector<1x32xf32>
    %122 = vector.broadcast %121 : vector<1x32xf32> to vector<8x32xf32>
    %123 = arith.addf %119, %122 : vector<8x32xf32>
    %124 = arith.addf %4, %123 : vector<8x32xf32>
    %c0_42 = arith.constant 0 : index
    %c2 = arith.constant 2 : index
    %c0_43 = arith.constant 0 : index
    %125 = vector.load %arg8[%c0_42, %c2, %c0_43] : memref<1x8x96xf32, #tpu.memory_space<vmem>>, vector<1x1x32xf32>
    %126 = vector.shape_cast %125 : vector<1x1x32xf32> to vector<1x32xf32>
    %c0_44 = arith.constant 0 : index
    %c3 = arith.constant 3 : index
    %c0_45 = arith.constant 0 : index
    %127 = vector.load %arg8[%c0_44, %c3, %c0_45] : memref<1x8x96xf32, #tpu.memory_space<vmem>>, vector<1x1x32xf32>
    %128 = vector.shape_cast %127 : vector<1x1x32xf32> to vector<1x32xf32>
    %cst_46 = arith.constant dense<0.000000e+00> : vector<8xf32>
    %129 = vector.multi_reduction <add>, %124, %cst_46 [1] : vector<8x32xf32> to vector<8xf32>
    %130 = vector.shape_cast %129 : vector<8xf32> to vector<8x1xf32>
    %cst_47 = arith.constant 3.200000e+01 : f32
    %131 = vector.broadcast %cst_47 : f32 to vector<8x1xf32>
    %132 = arith.divf %130, %131 : vector<8x1xf32>
    %133 = vector.broadcast %132 : vector<8x1xf32> to vector<8x32xf32>
    %134 = arith.subf %124, %133 : vector<8x32xf32>
    %135 = arith.mulf %134, %134 : vector<8x32xf32>
    %cst_48 = arith.constant dense<0.000000e+00> : vector<8xf32>
    %136 = vector.multi_reduction <add>, %135, %cst_48 [1] : vector<8x32xf32> to vector<8xf32>
    %137 = vector.shape_cast %136 : vector<8xf32> to vector<8x1xf32>
    %cst_49 = arith.constant 3.200000e+01 : f32
    %138 = vector.broadcast %cst_49 : f32 to vector<8x1xf32>
    %139 = arith.divf %137, %138 : vector<8x1xf32>
    %140 = vector.broadcast %132 : vector<8x1xf32> to vector<8x32xf32>
    %141 = arith.subf %124, %140 : vector<8x32xf32>
    %cst_50 = arith.constant 9.99999974E-6 : f32
    %142 = vector.broadcast %cst_50 : f32 to vector<8x1xf32>
    %143 = arith.addf %139, %142 : vector<8x1xf32>
    %144 = math.rsqrt %143 : vector<8x1xf32>
    %145 = vector.broadcast %144 : vector<8x1xf32> to vector<8x32xf32>
    %146 = arith.mulf %141, %145 : vector<8x32xf32>
    %147 = vector.broadcast %126 : vector<1x32xf32> to vector<8x32xf32>
    %148 = arith.mulf %146, %147 : vector<8x32xf32>
    %149 = vector.broadcast %128 : vector<1x32xf32> to vector<8x32xf32>
    %150 = arith.addf %148, %149 : vector<8x32xf32>
    %151 = arith.truncf %150 : vector<8x32xf32> to vector<8x32xbf16>
    %c0_51 = arith.constant 0 : index
    %c0_52 = arith.constant 0 : index
    %c0_53 = arith.constant 0 : index
    %152 = vector.load %arg6[%c0_51, %c0_52, %c0_53] : memref<1x32x64xbf16, #tpu.memory_space<vmem>>, vector<1x32x64xbf16>
    %153 = vector.shape_cast %152 : vector<1x32x64xbf16> to vector<32x64xbf16>
    %cst_54 = arith.constant dense<0.000000e+00> : vector<8x64xf32>
    %154 = tpu.matmul %151, %153, %cst_54 {dimension_numbers = #tpu.dot_dimension_numbers<[1], [0], [0], [1], [0, 0, 1, 1], [], []>} : vector<8x32xbf16>, vector<32x64xbf16>, vector<8x64xf32> -> vector<8x64xf32>
    %c0_55 = arith.constant 0 : index
    %c4 = arith.constant 4 : index
    %c0_56 = arith.constant 0 : index
    %155 = vector.load %arg8[%c0_55, %c4, %c0_56] : memref<1x8x96xf32, #tpu.memory_space<vmem>>, vector<1x1x64xf32>
    %156 = vector.shape_cast %155 : vector<1x1x64xf32> to vector<1x64xf32>
    %157 = vector.broadcast %156 : vector<1x64xf32> to vector<8x64xf32>
    %158 = arith.addf %154, %157 : vector<8x64xf32>
    %cst_57 = arith.constant 0.000000e+00 : f32
    %159 = vector.broadcast %cst_57 : f32 to vector<8x64xf32>
    %160 = arith.maximumf %158, %159 : vector<8x64xf32>
    %161 = arith.truncf %160 : vector<8x64xf32> to vector<8x64xbf16>
    %c0_58 = arith.constant 0 : index
    %c0_59 = arith.constant 0 : index
    %c0_60 = arith.constant 0 : index
    %162 = vector.load %arg7[%c0_58, %c0_59, %c0_60] : memref<1x64x32xbf16, #tpu.memory_space<vmem>>, vector<1x64x32xbf16>
    %163 = vector.shape_cast %162 : vector<1x64x32xbf16> to vector<64x32xbf16>
    %cst_61 = arith.constant dense<0.000000e+00> : vector<8x32xf32>
    %164 = tpu.matmul %161, %163, %cst_61 {dimension_numbers = #tpu.dot_dimension_numbers<[1], [0], [0], [1], [0, 0, 1, 1], [], []>} : vector<8x64xbf16>, vector<64x32xbf16>, vector<8x32xf32> -> vector<8x32xf32>
    %c0_62 = arith.constant 0 : index
    %c5 = arith.constant 5 : index
    %c0_63 = arith.constant 0 : index
    %165 = vector.load %arg8[%c0_62, %c5, %c0_63] : memref<1x8x96xf32, #tpu.memory_space<vmem>>, vector<1x1x32xf32>
    %166 = vector.shape_cast %165 : vector<1x1x32xf32> to vector<1x32xf32>
    %167 = vector.broadcast %166 : vector<1x32xf32> to vector<8x32xf32>
    %168 = arith.addf %164, %167 : vector<8x32xf32>
    %169 = arith.addf %150, %168 : vector<8x32xf32>
    %c0_64 = arith.constant 0 : index
    %c6 = arith.constant 6 : index
    %c0_65 = arith.constant 0 : index
    %170 = vector.load %arg8[%c0_64, %c6, %c0_65] : memref<1x8x96xf32, #tpu.memory_space<vmem>>, vector<1x1x32xf32>
    %171 = vector.shape_cast %170 : vector<1x1x32xf32> to vector<1x32xf32>
    %c0_66 = arith.constant 0 : index
    %c7 = arith.constant 7 : index
    %c0_67 = arith.constant 0 : index
    %172 = vector.load %arg8[%c0_66, %c7, %c0_67] : memref<1x8x96xf32, #tpu.memory_space<vmem>>, vector<1x1x32xf32>
    %173 = vector.shape_cast %172 : vector<1x1x32xf32> to vector<1x32xf32>
    %cst_68 = arith.constant dense<0.000000e+00> : vector<8xf32>
    %174 = vector.multi_reduction <add>, %169, %cst_68 [1] : vector<8x32xf32> to vector<8xf32>
    %175 = vector.shape_cast %174 : vector<8xf32> to vector<8x1xf32>
    %cst_69 = arith.constant 3.200000e+01 : f32
    %176 = vector.broadcast %cst_69 : f32 to vector<8x1xf32>
    %177 = arith.divf %175, %176 : vector<8x1xf32>
    %178 = vector.broadcast %177 : vector<8x1xf32> to vector<8x32xf32>
    %179 = arith.subf %169, %178 : vector<8x32xf32>
    %180 = arith.mulf %179, %179 : vector<8x32xf32>
    %cst_70 = arith.constant dense<0.000000e+00> : vector<8xf32>
    %181 = vector.multi_reduction <add>, %180, %cst_70 [1] : vector<8x32xf32> to vector<8xf32>
    %182 = vector.shape_cast %181 : vector<8xf32> to vector<8x1xf32>
    %cst_71 = arith.constant 3.200000e+01 : f32
    %183 = vector.broadcast %cst_71 : f32 to vector<8x1xf32>
    %184 = arith.divf %182, %183 : vector<8x1xf32>
    %185 = vector.broadcast %177 : vector<8x1xf32> to vector<8x32xf32>
    %186 = arith.subf %169, %185 : vector<8x32xf32>
    %cst_72 = arith.constant 9.99999974E-6 : f32
    %187 = vector.broadcast %cst_72 : f32 to vector<8x1xf32>
    %188 = arith.addf %184, %187 : vector<8x1xf32>
    %189 = math.rsqrt %188 : vector<8x1xf32>
    %190 = vector.broadcast %189 : vector<8x1xf32> to vector<8x32xf32>
    %191 = arith.mulf %186, %190 : vector<8x32xf32>
    %192 = vector.broadcast %171 : vector<1x32xf32> to vector<8x32xf32>
    %193 = arith.mulf %191, %192 : vector<8x32xf32>
    %194 = vector.broadcast %173 : vector<1x32xf32> to vector<8x32xf32>
    %195 = arith.addf %193, %194 : vector<8x32xf32>
    %c0_73 = arith.constant 0 : index
    %c0_74 = arith.constant 0 : index
    %c0_75 = arith.constant 0 : index
    %196 = vector.load %arg9[%c0_73, %c0_74, %c0_75] : memref<1x8x32xf32, #tpu.memory_space<vmem>>, vector<1x8x32xf32>
    %197 = vector.shape_cast %196 : vector<1x8x32xf32> to vector<8x32xf32>
    %198 = vector.shape_cast %195 : vector<8x32xf32> to vector<1x8x32xf32>
    tpu.vector_store %arg9[%c0_73, %c0_74, %c0_75], %198 {strides = array<i32>} : memref<1x8x32xf32, #tpu.memory_space<vmem>>, vector<1x8x32xf32>,
    return
  }
  func.func @transform_0(%arg0: i32, %arg1: i32) -> (i32, i32, i32) {
    %c0_i32 = arith.constant 0 : i32
    %c0_i32_0 = arith.constant 0 : i32
    %c0_i32_1 = arith.constant 0 : i32
    return %arg0, %c0_i32, %c0_i32_0 : i32, i32, i32
  }
  func.func @transform_1(%arg0: i32, %arg1: i32) -> (i32, i32, i32) {
    %c0_i32 = arith.constant 0 : i32
    %c0_i32_0 = arith.constant 0 : i32
    %c0_i32_1 = arith.constant 0 : i32
    return %arg0, %c0_i32, %c0_i32_0 : i32, i32, i32
  }
  func.func @transform_2(%arg0: i32, %arg1: i32) -> (i32, i32, i32) {
    %c0_i32 = arith.constant 0 : i32
    %c0_i32_0 = arith.constant 0 : i32
    %c0_i32_1 = arith.constant 0 : i32
    return %arg1, %c0_i32, %c0_i32_0 : i32, i32, i32
  }
  func.func @transform_3(%arg0: i32, %arg1: i32) -> (i32, i32, i32) {
    %c0_i32 = arith.constant 0 : i32
    %c0_i32_0 = arith.constant 0 : i32
    %c0_i32_1 = arith.constant 0 : i32
    return %arg1, %c0_i32, %c0_i32_0 : i32, i32, i32
  }
  func.func @transform_4(%arg0: i32, %arg1: i32) -> (i32, i32, i32) {
    %c0_i32 = arith.constant 0 : i32
    %c0_i32_0 = arith.constant 0 : i32
    %c0_i32_1 = arith.constant 0 : i32
    return %arg1, %c0_i32, %c0_i32_0 : i32, i32, i32
  }
  func.func @transform_5(%arg0: i32, %arg1: i32) -> (i32, i32, i32) {
    %c0_i32 = arith.constant 0 : i32
    %c0_i32_0 = arith.constant 0 : i32
    %c0_i32_1 = arith.constant 0 : i32
    return %arg1, %c0_i32, %c0_i32_0 : i32, i32, i32
  }
  func.func @transform_6(%arg0: i32, %arg1: i32) -> (i32, i32, i32) {
    %c0_i32 = arith.constant 0 : i32
    %c0_i32_0 = arith.constant 0 : i32
    %c0_i32_1 = arith.constant 0 : i32
    return %arg1, %c0_i32, %c0_i32_0 : i32, i32, i32
  }
  func.func @transform_7(%arg0: i32, %arg1: i32) -> (i32, i32, i32) {
    %c0_i32 = arith.constant 0 : i32
    %c0_i32_0 = arith.constant 0 : i32
    %c0_i32_1 = arith.constant 0 : i32
    return %arg0, %c0_i32, %c0_i32_0 : i32, i32, i32
  }
}

</mosaic_0001>

<bundles_post_ra>
// kernel: tpu_custom_call.1
= control target key start
LH: loop header
LB: loop body
LE: loop exit
PB: predicated region body
PF: predicated region fallthrough
CT: control target
= control target key end

     0   :  { %s2228_s0 = inlined_call_operand.hbm [shape: f32[2,8,32], index: 0, kind: input, shape index: {}]   ;;  %s2229_s1 = inlined_call_operand.vmem [shape: f32[2,1,8], index: 1, kind: input, shape index: {}]   ;;  %s2230_s2 = inlined_call_operand.vmem [shape: bf16[2,32,96], index: 2, kind: input, shape index: {}]   ;;  %s2231_s3 = inlined_call_operand.vmem [shape: bf16[2,32,32], index: 3, kind: input, shape index: {}]   ;;  %s2232_s4 = inlined_call_operand.vmem [shape: bf16[2,32,64], index: 4, kind: input, shape index: {}]   ;;  %s2233_s5 = inlined_call_operand.vmem [shape: bf16[2,64,32], index: 5, kind: input, shape index: {}]   ;;  %s2234_s6 = inlined_call_operand.vmem [shape: f32[2,8,96], index: 6, kind: input, shape index: {}]   ;;  %s2235_s7 = inlined_call_operand.hbm [shape: f32[2,8,32], index: 7, kind: output, shape index: {}]  }
   0x1   :  { %2247 = sst [smem:[#allocation18_spill]] %s2228_s0 }
   0x2   :  { %2248 = sst [smem:[#allocation19_spill]] %s2235_s7 }
   0x3   :  { %12 = vsyncpa [#allocation3], 0 }
   0x4   :  { %14 = vsyncpa [#allocation3 + $0x1], 0 }
   0x5   :  { %15 = vsyncpa [#allocation4], 0 }
   0x6   :  { %17 = vsyncpa [#allocation4 + $0x1], 0  ;;  %s1879_s24 = smov 0   ;;  %s1881_s25 = smov 0  }
   0x7   :  { %s1883_s26 = smov 0   ;;  %s1885_s27 = smov 0  }
   0x8   :  { %s1887_s28 = smov 0   ;;  %s1889_s29 = smov 0  }
   0x9   :  { %s1891_s30 = smov 0   ;;  %s1893_s8 = smov 0  }
   0xa LB: > { %2249 = sst [smem:[#allocation8_spill]] %s1790_s24  ;;  %s1394_s9 = sadd.s32 4294967295, %s1818_s8   ;;  %s1818_s8 = sphi %s1893_s8, %s23_s8   ;;  %s1814_s30 = sphi %s1891_s30, %s2281_s30   ;;  %s1810_s29 = sphi %s1889_s29, %s2280_s29   ;;  %s1806_s28 = sphi %s1887_s28, %s2279_s28   ;;  %s1802_s27 = sphi %s1885_s27, %s2278_s27   ;;  %s1798_s26 = sphi %s1883_s26, %s2277_s26   ;;  %s1794_s25 = sphi %s1881_s25, %s2276_s25   ;;  %s1790_s24 = sphi %s1879_s24, %s2275_s24  }
   0xb   : > { %2250 = sst [smem:[#allocation9_spill]] %s1794_s25  ;;  %s1395_s10 = sadd.s32 4294967294, %s1818_s8  }
   0xc   : > { %2251 = sst [smem:[#allocation10_spill]] %s1798_s26  ;;  %s32_s11 = sadd.s32 1, %s1810_s29 }
   0xd   : > { %2252 = sst [smem:[#allocation11_spill]] %s1810_s29  ;;  %s35_s12 = sadd.s32 1, %s1814_s30 }
   0xe   : > { %2253 = sst [smem:[#allocation12_spill]] %s1814_s30  ;;  %p33_p0 = scmp.ge.s32.totalorder %s32_s11, 2 }
   0xf   : > { %2254 = sst [smem:[#allocation13_spill]] %s1818_s8  ;;  %s42_s13 = sadd.s32 1, %s1798_s26 }
  0x10   : > { %p49_p1 = scmp.ne.s32.totalorder %s1798_s26, %s1794_s25  ;;  %p50_p2 = scmp.eq.s32.totalorder %s1818_s8, 0 }
  0x11   : > { %s2283_s11 = smov (%p33_p0, %s32_s11), 0  ;;  %s2285_s12 = smov (!%p33_p0, %s35_s12), %s1814_s30 }
  0x12   : > { %2255 = sst [smem:[#allocation14_spill]] %s2283_s11  ;;  %p1930_p3 = por %p50_p2, %p49_p1 }
  0x13   : > { %p55_p4 = scmp.ne.s32.totalorder %s1794_s25, %s1790_s24  ;;  %p37_p5 = scmp.ge.s32.totalorder %s2285_s12, 2 }
  0x14   : > { %p56_p6 = scmp.eq.s32.totalorder %s1394_s9, 0  ;;  %p235_p7 = scmp.eq.s32.totalorder %s1394_s9, 3 }
  0x15   : > { %p241_p8 = scmp.eq.s32.totalorder %s1395_s10, 3  ;;  %s2287_s12 = smov (%p37_p5, %s2285_s12), 0 }
  0x16   : > { %2257 = sst [smem:[#allocation15_spill]] %s2287_s12  ;;  %p1938_p9 = por %p56_p6, %p55_p4 }
  0x17   : > { %p1942_p10 = por %p235_p7, %p49_p1  ;;  %s39_s17 = ssub.s32 %s1814_s30, %s2287_s12 }
  0x18   : > { %p1948_p11 = por %p241_p8, %p55_p4  ;;  %p40_p12 = scmp.eq.s32.totalorder %s39_s17, 0 }
  0x19   : > { %s2259_s16 = scalar_select %p1942_p10, 1, 0 }
  0x1a   : > { %s2260_s18 = scalar_select %p1948_p11, 1, 0 }
  0x1b   : > { %p1577_p13 = scmp.lt.s32.totalorder %s1818_s8, 4  ;;  %s261_s19 = sand.u32 1, %s1798_s26  }
  0x1c   : > { %2261 = sst [smem:[#allocation16_spill]] %s2260_s18  ;;  %s1398_s21 = sshll.u32 %s261_s19, 3 }
  0x1d   : > { %s1955_s20 = scalar_select %p40_p12, %s1798_s26, %s42_s13  }
  0x1e   : > { %s1399_s22 = sshll.u32 %s1814_s30, 7  ;;  %s2263_s0 = sld [smem:[#allocation18_spill]] }
  0x1f   : > { %2262 = sst [smem:[#allocation17_spill]] %s1955_s20  ;;  %s265_s12 = scalar_lea.vmem [#allocation2], %s1398_s21 }
  0x20   : > { %s272_s11 = sshll.u32 %s265_s12, 4  ;;  %p1967_p0 = pnand %p1577_p13, %p1930_p3  ;;  %s1963_s11 = int_to_ptr.vmem [resolvable:$true] %s272_s11 }
  0x21   : > { %s262_s13 = scalar_lea.sflag [#allocation3], %s261_s19 }
  0x22   : > { %p1692_p5 = pneg %p1967_p0 }
  0x24   : > { %s1961_s10 = scalar_lea.hbm %s2263_s0, %s1399_s22  ;;  %s1695_s14 = scalar_lea.hbm %s2263_s0, 256 }
  0x25   : > { %s1690_s22 = scalar_lea.hbm %s1961_s10, 128  ;;  %p1696_p3 = scmp.lt.u32.totalorder %s1961_s10, %s2263_s0 }
  0x26   : > { %p1691_p4 = scmp.ne.s32.totalorder %s1961_s10, %s1690_s22  ;;  %p1697_p8 = scmp.lt.u32.totalorder %s1695_s14, %s1690_s22 }
  0x27   : > { %p1699_p13 = scmp.lt.u32.totalorder %s1690_s22, %s1961_s10 }
  0x28   : > { %p1693_p6 = pnand %p1692_p5, %p1691_p4  ;;  %p1698_p12 = por %p1697_p8, %p1696_p3 }
  0x2a   : > { %p1694_p7 = pneg %p1693_p6  ;;  %p1700_p1 = por %p1699_p13, %p1698_p12 }
  0x2c   : > { %p1701_p2 = pnand %p1700_p1, %p1694_p7 }
  0x2e   : > { %1704 = shalt.err (!%p1701_p2)
}
  0x2f   : > { %s1705_s19 = scalar_lea.vmem %s1963_s11, 128  ;;  %s1820_s12 = smov [#allocation2]  }
  0x30   : > { %p1706_p4 = scmp.ne.s32.totalorder %s1963_s11, %s1705_s19  ;;  %s1710_s21 = sshll.u32 %s1820_s12, 4  ;;  %s1711_s21 = int_to_ptr.vmem [resolvable:$false] %s1710_s21 }
  0x31   : > { %s1712_s23 = scalar_lea.vmem %s1711_s21, 256  ;;  %p1713_p10 = scmp.lt.s32.totalorder %s1963_s11, %s1711_s21 }
  0x32   : > { %p1708_p6 = pnand %p1706_p4, %p1692_p5  ;;  %p1714_p3 = scmp.lt.s32.totalorder %s1712_s23, %s1705_s19 }
  0x34   : > { %p1709_p11 = pneg %p1708_p6  ;;  %p1715_p8 = por %p1714_p3, %p1713_p10 }
  0x36   : > { %p1716_p12 = pnand %p1715_p8, %p1709_p11 }
  0x38   : > { %1719 = shalt.err (!%p1716_p12)
}
  0x39   : > { %1572 = dma.hbm_to_vmem [thread:$0]  (!%p1967_p0), %s1961_s10, 128, %s1963_s11, %s262_s13  }
  0x3a   : > { %p2265_p1 = scmp.lt.s32.totalorder %s1818_s8, 5  ;;  %p2266_p2 = scmp.ge.s32.totalorder %s1818_s8, 1 }
  0x3c   : > { %p323_p5 = pnand %p2266_p2, %p2265_p1 }
  0x3d   : > { %s2003_s22 = sand.u32 (!%p323_p5), 1, %s1794_s25  }
  0x3e   : > { %326 = sbr.rel (%p323_p5) target bundleno = 2479 (0x9af), region = 48  ;;  %s1401_s14 = sshll.u32 (!%p323_p5), %s2003_s22, 3 }
  0x3f   : > { %s329_s9 = scalar_lea.sflag (!%p323_p5), [#allocation3], %s2003_s22  ;;  %s332_s19 = scalar_lea.vmem (!%p323_p5), [#allocation2], %s1401_s14 }
  0x45   : > { %1781 = dma.done.wait (%p1938_p9), %s329_s9, 128  }
  0x46   : > { %1783 = vsyncadd (%p1938_p9), %s329_s9, 4294967168  ;;  %p390_p10 = scmp.lt.s32.totalorder %s1806_s28, 1  ;;  %p393_p11 = scmp.lt.s32.totalorder %s1802_s27, 1 }
  0x47   : > { %s2044_s30 = scalar_lea.vmem [#allocation5], %s1401_s14  ;;  %p1412_p9 = scmp.ne.s32.totalorder %s1802_s27, 0 }
  0x48   : > { %s2014_s11 = scalar_select %p390_p10, %s1806_s28, 1 }
  0x49   : > { %s394_s10 = scalar_select %p393_p11, %s1802_s27, 1 }
  0x4a   : > { %421 = sbr.rel (%p1412_p9) target bundleno = 81 (0x51), region = 56  ;;  %v422_v0 = vld [vmem:[%s332_s19] sm:$0xff] (!%p1412_p9)  ;;  %vm423_vm0 = vcmask (!%p1412_p9), 261120  }
  0x4b   : > { %s1447_s21 = sshll.u32 %s394_s10, 4  ;;  %s1450_s23 = sshll.u32 %s394_s10, 5  ;;  %424 = vst.msk [vmem:[%s2044_s30] sm:$0xff] (!%p1412_p9), %vm423_vm0, %v422_v0 }
  0x4c   : > { %s397_s15 = scalar_lea.vmem %s2230_s2, %s1447_s21  ;;  %s2027_s20 = scalar_lea.vmem %s2231_s3, %s1447_s21 }
  0x4d   : > { %s2032_s18 = scalar_lea.vmem %s2232_s4, %s1447_s21  ;;  %s2037_s17 = scalar_lea.vmem %s2233_s5, %s1450_s23 }
  0x4e   : > { %s1411_s13 = sshll.u32 %s394_s10, 3 }
  0x4f   : > { %s2042_s0 = scalar_lea.vmem %s2234_s6, %s1411_s13 }
  0x51 PF: > { %v1660_v1 = vld [vmem:[%s397_s15] sm:$0xff]   ;;  %v1821_v2 = vmov 0.0   ;;  %v1661_v3 = vld [vmem:[%s397_s15 + $0x8] sm:$0xff]   ;;  %vm1822_vm1 = vmmov 0   ;;  %vm448_vm2 = vcmask 261120   ;;  %s1823_s7 = smov 120   ;;  %v546_v24 = vlaneseq  ;;  %s2267_s10 = scalar_lea.vmem %s2229_s1, %s2014_s11 }
  0x52   : > { %1481 = vmatprep.subr.bf16.mxu0 %v1821_v2  ;;  %1489 = vmatprep.subr.bf16.mxu1 %v1821_v2  ;;  %v2053_v4 = vld [vmem:[%s2044_s30] sm:$0xff]  ;;  %v1413_v6 = vld [vmem:[%s2042_s0] ss:$0 sm:$0xff]  ;;  %s1824_s24 = smov 96   ;;  %s1825_s25 = smov 80   ;;  %vm497_vm3 = vcmask 64512  }
  0x53   : > { %1482 = vmatpush3.bf16.msra.mxu0 %v1660_v1  ;;  %1485 = vmatprep.mubr.msk.bf16.mxu0 %vm1822_vm1, %v1821_v2  ;;  %v426_v5 = vpack.c.bf16 %v2053_v4, %v2053_v4  ;;  %s1826_s26 = smov 88   ;;  %s1827_s27 = smov 72   ;;  %v492_v25 = vld [vmem:[%s2267_s10] sm:$0x1]  ;;  %v547_v26 = vshrl.u32 %v546_v24, 7  ;;  %v1830_v28 = vmov 0  }
  0x54   : > { %1483 = vmatprep.subr.bf16.mxu0 %v1821_v2  ;;  %1491 = vmatprep.mubr.msk.bf16.mxu1 %vm1822_vm1, %v1821_v2  ;;  %s1828_s29 = smov 112   ;;  %s1829_s8 = smov 104   ;;  %vm544_vm4 = vcmp.eq.f32.partialorder %v492_v25, 0.0  ;;  %vm564_vm6 = vcmask 1043456   ;;  %vm959_vm7 = vcmask 130048   ;;  %vm961_vm8 = vcmask 195584  }
  0x55   : > { %v548_v27 = vsub.s32 0, %v547_v26  ;;  %v545_v29 = vsel %vm544_vm4, 1, %v1830_v28  ;;  %s1831_s11 = smov 56   ;;  %s1832_s12 = smov 64   ;;  %vm1159_vm9 = vcmask 523264  }
  0x56   : > { %s1833_s21 = smov 40   ;;  %s1834_s23 = smov 48  }
  0x57   : > { %1484 = vmatpush3.bf16.msra.mxu0 %v1661_v3  ;;  %v549_v30 = vrot.slane %v545_v29, %v548_v27  ;;  %s1835_s15 = smov 8   ;;  %s1836_s9 = smov 16  }
  0x58   : > { %1495 = vmatprep.subr.bf16.mxu0 %v1821_v2  ;;  %s1837_s13 = smov 24   ;;  %p2270_p7 = scmp.ne.s32.totalorder %s2259_s16, 0 }
  0x59   : > { %vm550_vm5 = vcmp.eq.s32.totalorder %v549_v30, 1 }
  0x5a   : > { %1486 = vmatmul.mubr.msk.bf16.vlgmr.msra.gmra.mrb[0].mxu0 %vm448_vm2, %v426_v5 }
  0x5b   : > { %1497 = vmatprep.mubr.msk.bf16.mxu0 %vm1822_vm1, %v1821_v2 }
 0x12d   : > { %v486_v7 = vpop.f32.mrb[0].mxu0 }
 0x12e   : > { %v487_v8 = vadd.f32 %v1413_v6, %v486_v7  ;;  %v1487_v9 = vpop.f32.mrb[1].mxu0 }
 0x12f   : > { %v489_v10 = vpop.f32.mrb[2].mxu0 }
 0x130   : > { %v2065_v11 = vpack.c.bf16 %v487_v8, %v487_v8  ;;  %v1488_v12 = vpop.f32.mrb[3].mxu0 }
 0x132   : > { %613 = vrot.lane.b32.xlu1 %v2065_v11, %s1823_s7  ;;  %495 = vrot.lane.b32.xlu0 %v2065_v11, %s1824_s24  ;;  %s2268_s24 = sld [smem:[#allocation19_spill]] }
 0x136   : > { %726 = vrot.lane.b32.xlu1 %v2065_v11, %s1825_s25  ;;  %615 = vrot.lane.b32.xlu0 %v2065_v11, %s1826_s26  ;;  %s1231_s26 = scalar_lea.sflag [#allocation4], %s2003_s22 }
 0x138   : > { %s2269_s14 = smov %s2268_s24 }
 0x13a   : > { %837 = vrot.lane.b32.xlu1 %v2065_v11, %s1827_s27  ;;  %724 = vrot.lane.b32.xlu0 %v2065_v11, %s1828_s29 }
 0x13e   : > { %835 = vrot.lane.b32.xlu0 %v2065_v11, %s1829_s8 }
 0x1a4   : > { %v496_v13 = vpop.permute.xlu0 %495  ;;  %v614_v16 = vpop.permute.xlu1 %613 }
 0x1a5   : > { %v502_v14 = vsel %vm497_vm3, %v496_v13, 0 }
 0x1a6   : > { %1490 = vmatpush3.bf16.xpose.msra.mxu1 %v502_v14 }
 0x1a7   : > { %1501 = vmatprep.subr.bf16.mxu1 %v1821_v2 }
 0x1a8   : > { %v616_v15 = vpop.permute.xlu0 %615  ;;  %v727_v18 = vpop.permute.xlu1 %726 }
 0x1a9   : > { %v621_v17 = vsel %vm497_vm3, %v616_v15, 0  ;;  %v732_v19 = vsel %vm497_vm3, %v727_v18, 0 }
 0x1ac   : > { %v838_v20 = vpop.permute.xlu1 %837  ;;  %v725_v21 = vpop.permute.xlu0 %724 }
 0x1ad   : > { %1492 = vmatmul.mubr.msk.bf16.vlgmr.msra.gmra.mrb[0].mxu1 %vm497_vm3, %v2065_v11  ;;  %v843_v22 = vsel %vm497_vm3, %v838_v20, 0 }
 0x1ae   : > { %1502 = vmatpush3.bf16.xpose.msra.mxu1 %v621_v17  ;;  %1503 = vmatprep.mubr.msk.bf16.mxu1 %vm1822_vm1, %v1821_v2 }
 0x1af   : > { %1513 = vmatprep.subr.bf16.mxu1 %v1821_v2 }
 0x1b0   : > { %v836_v23 = vpop.permute.xlu0 %835 }
 0x1b5   : > { %1504 = vmatmul.mubr.msk.bf16.vlgmr.msra.gmra.mrb[4].mxu1 %vm497_vm3, %v614_v16 }
 0x1b6   : > { %1514 = vmatpush3.bf16.xpose.msra.mxu1 %v732_v19  ;;  %1515 = vmatprep.mubr.msk.bf16.mxu1 %vm1822_vm1, %v1821_v2 }
 0x1b7   : > { %1525 = vmatprep.subr.bf16.mxu1 %v1821_v2 }
 0x1bd   : > { %1516 = vmatmul.mubr.msk.bf16.vlgmr.msra.gmra.mrb[8].mxu1 %vm497_vm3, %v725_v21 }
 0x1be   : > { %1526 = vmatpush3.bf16.xpose.msra.mxu1 %v843_v22  ;;  %1527 = vmatprep.mubr.msk.bf16.mxu1 %vm1822_vm1, %v1821_v2 }
 0x1bf   : > { %1537 = vmatprep.subr.bf16.mxu1 %v1821_v2 }
 0x1c5   : > { %1528 = vmatmul.mubr.msk.bf16.vlgmr.msra.gmra.mrb[12].mxu1 %vm497_vm3, %v836_v23 }
 0x1c6   : > { %1541 = vmatprep.mubr.msk.bf16.mxu1 %vm1822_vm1, %v1821_v2 }
 0x280   : > { %v538_v31 = vpop.f32.mrb[0].mxu1 }
 0x281   : > { %v551_v32 = vsel %vm550_vm5, -1e+10, %v538_v31  ;;  %v1493_v33 = vpop.f32.mrb[1].mxu1 }
 0x282   : > { %v541_v34 = vpop.f32.mrb[2].mxu1  ;;  %v552_v35 = vsel %vm497_vm3, %v551_v32, -inf }
 0x283   : > { %553 = vmax.xlane.f32.xlu1 %v552_v35  ;;  %v1494_v36 = vpop.f32.mrb[3].mxu1 }
 0x288   : > { %v657_v37 = vpop.f32.mrb[4].mxu1 }
 0x289   : > { %v663_v38 = vsel %vm550_vm5, -1e+10, %v657_v37  ;;  %v1505_v39 = vpop.f32.mrb[5].mxu1  ;;  %v1662_v37 = vld [vmem:[%s2027_s20] sm:$0xff]  }
 0x28a   : > { %v660_v40 = vpop.f32.mrb[6].mxu1  ;;  %v664_v41 = vsel %vm497_vm3, %v663_v38, -inf  ;;  %1538 = vmatpush3.bf16.msra.mxu1 %v1662_v37  ;;  %v1663_v39 = vld [vmem:[%s2027_s20 + $0x8] sm:$0xff]   ;;  %s1244_s20 = sshll.u32 %s2044_s30, 4  ;;  %s2174_s20 = int_to_ptr.vmem [resolvable:$true] %s1244_s20 }
 0x28b   : > { %665 = vmax.xlane.f32.xlu0 %v664_v41  ;;  %v1506_v42 = vpop.f32.mrb[7].mxu1  ;;  %1539 = vmatprep.subr.bf16.mxu1 %v1821_v2  ;;  %s1720_s27 = scalar_lea.vmem %s2174_s20, 128 }
 0x28c   : > { %p1721_p0 = scmp.ne.s32.totalorder %s2174_s20, %s1720_s27 }
 0x28e   : > { %1540 = vmatpush3.bf16.msra.mxu1 %v1663_v39  ;;  %p1722_p13 = pnand %p1721_p0, %p2270_p7 }
 0x28f   : > { %1553 = vmatprep.subr.bf16.mxu1 %v1821_v2 }
 0x290   : > { %v768_v43 = vpop.f32.mrb[8].mxu1  ;;  %p1723_p4 = pneg %p1722_p13 }
 0x291   : > { %v774_v44 = vsel %vm550_vm5, -1e+10, %v768_v43  ;;  %v1517_v45 = vpop.f32.mrb[9].mxu1 }
 0x292   : > { %v771_v46 = vpop.f32.mrb[10].mxu1  ;;  %v775_v47 = vsel %vm497_vm3, %v774_v44, -inf }
 0x293   : > { %776 = vmax.xlane.f32.xlu0 %v775_v47  ;;  %v1518_v48 = vpop.f32.mrb[11].mxu1 }
 0x294   : > { %671 = vrot.lane.b32.xlu1 %v2065_v11, %s1831_s11 }
 0x298   : > { %v879_v49 = vpop.f32.mrb[12].mxu1 }
 0x299   : > { %v1529_v50 = vpop.f32.mrb[13].mxu1  ;;  %v885_v53 = vsel %vm550_vm5, -1e+10, %v879_v49 }
 0x29a   : > { %v882_v51 = vpop.f32.mrb[14].mxu1  ;;  %v886_v54 = vsel %vm497_vm3, %v885_v53, -inf }
 0x29b   : > { %v1530_v52 = vpop.f32.mrb[15].mxu1 }
 0x2a9   : > { %559 = vrot.lane.b32.xlu0 %v2065_v11, %s1832_s12 }
 0x2ad   : > { %893 = vrot.lane.b32.xlu0 %v2065_v11, %s1833_s21 }
 0x2b8   : > { %887 = vmax.xlane.f32.xlu1 %v886_v54 }
 0x2c9   : > { %782 = vrot.lane.b32.xlu1 %v2065_v11, %s1834_s23 }
 0x310   : > { %v554_v55 = vpop.xlane.xlu1 %553 }
 0x311   : > { %v555_v56 = vsub.f32 %v551_v32, %v554_v55 }
 0x313   : > { %v556_v57 = vmul.f32 1.442695, %v555_v56 }
 0x314   : > { %v672_v5 = vpop.permute.xlu1 %671 }
 0x315   : > { %1670 = vpow2.f32 %v556_v57  ;;  %v677_v9 = vsel %vm564_vm6, %v672_v5, 0 }
 0x318   : > { %v666_v58 = vpop.xlane.xlu0 %665 }
 0x319   : > { %v667_v59 = vsub.f32 %v663_v38, %v666_v58 }
 0x31b   : > { %v668_v60 = vmul.f32 1.442695, %v667_v59 }
 0x31d   : > { %1672 = vpow2.f32 %v668_v60 }
 0x31f   : > { %v1671_v0 = vpop.eup %1670 }
 0x320   : > { %v777_v61 = vpop.xlane.xlu0 %776  ;;  %v558_v7 = vpack.c.bf16 %v1671_v0, %v1671_v0  ;;  %v608_v10 = vsel %vm497_vm3, %v1671_v0, 0.0 }
 0x321   : > { %v778_v62 = vsub.f32 %v774_v44, %v777_v61 }
 0x323   : > { %v779_v63 = vmul.f32 1.442695, %v778_v62  ;;  %v1425_v62 = vld [vmem:[%s2042_s0 + $0x1] ss:$0 sm:$0xff] }
 0x324   : > { %v560_v1 = vpop.permute.xlu0 %559 }
 0x325   : > { %1674 = vpow2.f32 %v779_v63  ;;  %v566_v3 = vsel %vm564_vm6, %v560_v1, 0 }
 0x326   : > { %1496 = vmatpush3.bf16.msra.mxu0 %v566_v3 }
 0x327   : > { %v1673_v6 = vpop.eup %1672  ;;  %1507 = vmatprep.subr.bf16.mxu0 %v1821_v2 }
 0x328   : > { %v719_v8 = vsel %vm497_vm3, %v1673_v6, 0.0  ;;  %v670_v12 = vpack.c.bf16 %v1673_v6, %v1673_v6  ;;  %v894_v19 = vpop.permute.xlu0 %893 }
 0x329   : > { %720 = vadd.xlane.f32.xlu1 %v719_v8  ;;  %1498 = vmatmul.mubr.msk.bf16.vlgmr.msra.gmra.mrb[4].mxu0 %vm497_vm3, %v558_v7  ;;  %v899_v21 = vsel %vm564_vm6, %v894_v19, 0 }
 0x32a   : > { %1508 = vmatpush3.bf16.msra.mxu0 %v677_v9  ;;  %1509 = vmatprep.mubr.msk.bf16.mxu0 %vm1822_vm1, %v1821_v2 }
 0x32b   : > { %1519 = vmatprep.subr.bf16.mxu0 %v1821_v2 }
 0x32d   : > { %609 = vadd.xlane.f32.xlu1 %v608_v10 }
 0x32f   : > { %v1675_v11 = vpop.eup %1674 }
 0x330   : > { %v830_v13 = vsel %vm497_vm3, %v1675_v11, 0.0  ;;  %v781_v20 = vpack.c.bf16 %v1675_v11, %v1675_v11 }
 0x331   : > { %831 = vadd.xlane.f32.xlu0 %v830_v13  ;;  %1510 = vmatmul.mubr.msk.bf16.vlgmr.msra.gmra.mrb[8].mxu0 %vm497_vm3, %v670_v12  ;;  %v1664_v13 = vld [vmem:[%s2032_s18] sm:$0xff]  }
 0x332   : > { %1521 = vmatprep.mubr.msk.bf16.mxu0 %vm1822_vm1, %v1821_v2 }
 0x345   : > { %v888_v14 = vpop.xlane.xlu1 %887 }
 0x346   : > { %v889_v15 = vsub.f32 %v885_v53, %v888_v14  ;;  %v1665_v14 = vld [vmem:[%s2032_s18 + $0x8] sm:$0xff]   ;;  %s1444_s18 = sshll.u32 %s1806_s28, 7  ;;  %s1838_s28 = smov [#allocation5]  }
 0x347   : > { %s2172_s25 = scalar_lea.hbm %s2268_s24, %s1444_s18 }
 0x348   : > { %v890_v16 = vmul.f32 1.442695, %v889_v15  ;;  %v1667_v15 = vld [vmem:[%s2037_s17 + $0x8] sm:$0xff]  }
 0x349   : > { %v783_v17 = vpop.permute.xlu1 %782 }
 0x34a   : > { %1676 = vpow2.f32 %v890_v16  ;;  %v788_v18 = vsel %vm564_vm6, %v783_v17, 0 }
 0x34b   : > { %1520 = vmatpush3.bf16.msra.mxu0 %v788_v18 }
 0x34c   : > { %1531 = vmatprep.subr.bf16.mxu0 %v1821_v2 }
 0x34e   : > { %1522 = vmatmul.mubr.msk.bf16.vlgmr.msra.gmra.mrb[12].mxu0 %vm497_vm3, %v781_v20  ;;  %v1429_v20 = vld [vmem:[%s2042_s0 + $0x2] ss:$0 sm:$0xff] }
 0x34f   : > { %1532 = vmatpush3.bf16.msra.mxu0 %v899_v21  ;;  %1533 = vmatprep.mubr.msk.bf16.mxu0 %vm1822_vm1, %v1821_v2 }
 0x350   : > { %1545 = vmatprep.subr.bf16.mxu0 %v1821_v2 }
 0x354   : > { %v1677_v22 = vpop.eup %1676 }
 0x355   : > { %v941_v23 = vsel %vm497_vm3, %v1677_v22, 0.0  ;;  %v892_v24 = vpack.c.bf16 %v1677_v22, %v1677_v22  ;;  %v1430_v22 = vld [vmem:[%s2042_s0 + $0x3] ss:$0 sm:$0xff] }
 0x356   : > { %942 = vadd.xlane.f32.xlu0 %v941_v23 }
 0x357   : > { %1534 = vmatmul.mubr.msk.bf16.vlgmr.msra.gmra.mrb[16].mxu0 %vm497_vm3, %v892_v24 }
 0x358   : > { %1549 = vmatprep.mubr.msk.bf16.mxu0 %vm1822_vm1, %v1821_v2  ;;  %1546 = vmatpush3.bf16.msra.mxu0 %v1664_v13 }
 0x359   : > { %1547 = vmatprep.subr.bf16.mxu0 %v1821_v2 }
 0x35c   : > { %1548 = vmatpush3.bf16.msra.mxu0 %v1665_v14 }
 0x3b6   : > { %v721_v25 = vpop.xlane.xlu1 %720 }
 0x3b7   : > { %1678 = vrcp.f32 %v721_v25 }
 0x3ba   : > { %v610_v52 = vpop.xlane.xlu1 %609 }
 0x3be   : > { %v832_v36 = vpop.xlane.xlu0 %831 }
 0x3bf   : > { %1680 = vrcp.f32 %v832_v36  ;;  %v1435_v36 = vld [vmem:[%s2042_s0 + $0x5] ss:$0 sm:$0xff] }
 0x3c1   : > { %v1679_v30 = vpop.eup %1678 }
 0x3c9   : > { %v1681_v40 = vpop.eup %1680 }
 0x3e3   : > { %v943_v38 = vpop.xlane.xlu0 %942 }
 0x3e4   : > { %1682 = vrcp.f32 %v943_v38 }
 0x3e5   : > { %1684 = vrcp.f32 %v610_v52  ;;  %v1441_v52 = vld [vmem:[%s2042_s0 + $0x6] ss:$0 sm:$0xff] }
 0x3ee   : > { %v1683_v46 = vpop.eup %1682 }
 0x3ef   : > { %v1685_v53 = vpop.eup %1684 }
 0x3fc   : > { %v602_v26 = vpop.f32.mrb[4].mxu0 }
 0x3fd   : > { %v1499_v27 = vpop.f32.mrb[5].mxu0  ;;  %v612_v56 = vmul.f32 %v1685_v53, %v602_v26  ;;  %v1668_v26 = vld [vmem:[%s2037_s17 + $0x10] sm:$0xff]  }
 0x3fe   : > { %v605_v28 = vpop.f32.mrb[6].mxu0  ;;  %v1669_v27 = vld [vmem:[%s2037_s17 + $0x18] sm:$0xff]  }
 0x3ff   : > { %v1500_v29 = vpop.f32.mrb[7].mxu0  ;;  %v1431_v28 = vld [vmem:[%s2042_s0 + $0x4] ss:$0 sm:$0xff] }
 0x404   : > { %v713_v31 = vpop.f32.mrb[8].mxu0 }
 0x405   : > { %v723_v32 = vmul.f32 %v1679_v30, %v713_v31  ;;  %v1511_v33 = vpop.f32.mrb[9].mxu0 }
 0x406   : > { %v716_v34 = vpop.f32.mrb[10].mxu0 }
 0x407   : > { %947 = vrot.lane.b32.xlu0 %v723_v32, %s1835_s15  ;;  %v1512_v35 = vpop.f32.mrb[11].mxu0 }
 0x421   : > { %v824_v41 = vpop.f32.mrb[12].mxu0 }
 0x422   : > { %v834_v42 = vmul.f32 %v1681_v40, %v824_v41  ;;  %v1523_v43 = vpop.f32.mrb[13].mxu0 }
 0x423   : > { %v827_v44 = vpop.f32.mrb[14].mxu0 }
 0x424   : > { %951 = vrot.lane.b32.xlu1 %v834_v42, %s1836_s9  ;;  %v1524_v45 = vpop.f32.mrb[15].mxu0 }
 0x42a   : > { %v935_v47 = vpop.f32.mrb[16].mxu0 }
 0x42b   : > { %v945_v48 = vmul.f32 %v1683_v46, %v935_v47  ;;  %v1535_v49 = vpop.f32.mrb[17].mxu0 }
 0x42c   : > { %v938_v50 = vpop.f32.mrb[18].mxu0 }
 0x42d   : > { %955 = vrot.lane.b32.xlu1 %v945_v48, %s1837_s13  ;;  %v1536_v51 = vpop.f32.mrb[19].mxu0 }
 0x479   : > { %v948_v54 = vpop.permute.xlu0 %947 }
 0x47a   : > { %v958_v57 = vsel %vm497_vm3, %v612_v56, %v948_v54  ;;  %v1442_v54 = vld [vmem:[%s2042_s0 + $0x7] ss:$0 sm:$0xff]  ;;  %s1724_s0 = sshll.u32 %s1838_s28, 4  ;;  %s1725_s0 = int_to_ptr.vmem [resolvable:$false] %s1724_s0 }
 0x47b   : > { %s1726_s29 = scalar_lea.vmem %s1725_s0, 256  ;;  %p1727_p6 = scmp.lt.s32.totalorder %s2174_s20, %s1725_s0 }
 0x47c   : > { %p1728_p3 = scmp.lt.s32.totalorder %s1726_s29, %s1720_s27 }
 0x47e   : > { %p1729_p8 = por %p1728_p3, %p1727_p6 }
 0x480   : > { %p1730_p12 = pnand %p1729_p8, %p1723_p4 }
 0x496   : > { %v952_v55 = vpop.permute.xlu1 %951 }
 0x497   : > { %v960_v58 = vsel %vm959_vm7, %v958_v57, %v952_v55 }
 0x49f   : > { %v956_v59 = vpop.permute.xlu1 %955 }
 0x4a0   : > { %v962_v60 = vsel %vm961_vm8, %v960_v58, %v956_v59 }
 0x4a1   : > { %v963_v61 = vpack.c.bf16 %v962_v60, %v962_v60 }
 0x4a3   : > { %1542 = vmatmul.mubr.msk.bf16.vlgmr.msra.gmra.mrb[16].mxu1 %vm448_vm2, %v963_v61 }
 0x4a4   : > { %1561 = vmatprep.mubr.msk.bf16.mxu1 %vm1822_vm1, %v1821_v2 }
 0x576   : > { %v1022_v63 = vpop.f32.mrb[16].mxu1 }
 0x577   : > { %v1023_v0 = vadd.f32 %v1425_v62, %v1022_v63  ;;  %v1543_v1 = vpop.f32.mrb[17].mxu1 }
 0x578   : > { %v1025_v3 = vpop.f32.mrb[18].mxu1 }
 0x579   : > { %v1544_v5 = vpop.f32.mrb[19].mxu1  ;;  %v1028_v6 = vadd.f32 %v1023_v0, %v2053_v4  ;;  %v1666_v4 = vld [vmem:[%s2037_s17] sm:$0xff]  }
 0x57a   : > { %1554 = vmatpush3.bf16.msra.mxu1 %v1666_v4 }
 0x57b   : > { %v1031_v7 = vsel %vm448_vm2, %v1028_v6, 0.0  ;;  %1555 = vmatprep.subr.bf16.mxu1 %v1821_v2 }
 0x57c   : > { %1032 = vadd.xlane.f32.xlu0 %v1031_v7 }
 0x57e   : > { %1556 = vmatpush3.bf16.msra.mxu1 %v1667_v15 }
 0x57f   : > { %1557 = vmatprep.subr.bf16.mxu1 %v1821_v2 }
 0x582   : > { %1558 = vmatpush3.bf16.msra.mxu1 %v1668_v26 }
 0x583   : > { %1559 = vmatprep.subr.bf16.mxu1 %v1821_v2 }
 0x586   : > { %1560 = vmatpush3.bf16.msra.mxu1 %v1669_v27 }
 0x609   : > { %v1033_v8 = vpop.xlane.xlu0 %1032 }
 0x60a   : > { %v1035_v9 = vmul.f32 0.03125, %v1033_v8 }
 0x60c   : > { %v1036_v10 = vsub.f32 %v1028_v6, %v1035_v9 }
 0x60e   : > { %v1037_v11 = vmul.f32 %v1036_v10, %v1036_v10 }
 0x610   : > { %v1038_v12 = vsel %vm448_vm2, %v1037_v11, 0.0 }
 0x611   : > { %1039 = vadd.xlane.f32.xlu1 %v1038_v12 }
 0x69e   : > { %v1040_v16 = vpop.xlane.xlu1 %1039 }
 0x69f   : > { %v1041_v17 = vmul.f32 0.03125, %v1040_v16 }
 0x6a1   : > { %v1042_v18 = vadd.f32 1e-05, %v1041_v17 }
 0x6a3   : > { %1686 = vrsqrt.f32 %v1042_v18 }
 0x6ad   : > { %v1687_v19 = vpop.eup %1686 }
 0x6ae   : > { %v1044_v21 = vmul.f32 %v1687_v19, %v1036_v10 }
 0x6b0   : > { %v1049_v23 = vmul.f32 %v1429_v20, %v1044_v21 }
 0x6b2   : > { %v1054_v24 = vadd.f32 %v1430_v22, %v1049_v23 }
 0x6b4   : > { %v1055_v25 = vpack.c.bf16 %v1054_v24, %v1054_v24 }
 0x6b6   : > { %1550 = vmatmul.mubr.msk.bf16.vlgmr.msra.gmra.mrb[20].mxu0 %vm448_vm2, %v1055_v25 }
 0x789   : > { %v1114_v29 = vpop.f32.mrb[20].mxu0 }
 0x78a   : > { %v1115_v30 = vadd.f32 %v1431_v28, %v1114_v29  ;;  %v1551_v31 = vpop.f32.mrb[21].mxu0 }
 0x78b   : > { %v1117_v32 = vpop.f32.mrb[22].mxu0 }
 0x78c   : > { %v1120_v33 = vmax.f32 %v1115_v30, 0.0  ;;  %v1552_v34 = vpop.f32.mrb[23].mxu0 }
 0x78e   : > { %v1121_v35 = vpack.c.bf16 %v1120_v33, %v1120_v33 }
 0x790   : > { %1562 = vmatmul.mubr.msk.bf16.vlgmr.msra.gmra.mrb[20].mxu1 %vm1159_vm9, %v1121_v35 }
 0x863   : > { %v1197_v37 = vpop.f32.mrb[20].mxu1 }
 0x864   : > { %v1198_v38 = vadd.f32 %v1435_v36, %v1197_v37  ;;  %v1563_v39 = vpop.f32.mrb[21].mxu1 }
 0x865   : > { %v1200_v40 = vpop.f32.mrb[22].mxu1 }
 0x866   : > { %v1564_v41 = vpop.f32.mrb[23].mxu1  ;;  %v1203_v2 = vadd.f32 %v1198_v38, %v1054_v24 }
 0x868   : > { %v1206_v42 = vsel %vm448_vm2, %v1203_v2, 0.0 }
 0x869   : > { %1207 = vadd.xlane.f32.xlu0 %v1206_v42 }
 0x8f6   : > { %v1208_v43 = vpop.xlane.xlu0 %1207 }
 0x8f7   : > { %v1209_v44 = vmul.f32 0.03125, %v1208_v43 }
 0x8f9   : > { %v1210_v45 = vsub.f32 %v1203_v2, %v1209_v44 }
 0x8fb   : > { %v1211_v46 = vmul.f32 %v1210_v45, %v1210_v45 }
 0x8fd   : > { %v1212_v47 = vsel %vm448_vm2, %v1211_v46, 0.0 }
 0x8fe   : > { %1213 = vadd.xlane.f32.xlu0 %v1212_v47 }
 0x98b   : > { %v1214_v48 = vpop.xlane.xlu0 %1213 }
 0x98c   : > { %v1215_v49 = vmul.f32 0.03125, %v1214_v48 }
 0x98e   : > { %v1216_v50 = vadd.f32 1e-05, %v1215_v49 }
 0x990   : > { %1688 = vrsqrt.f32 %v1216_v50 }
 0x99a   : > { %v1689_v51 = vpop.eup %1688 }
 0x99b   : > { %v1218_v53 = vmul.f32 %v1689_v51, %v1210_v45 }
 0x99d   : > { %v1223_v55 = vmul.f32 %v1441_v52, %v1218_v53 }
 0x99f   : > { %v1228_v56 = vadd.f32 %v1442_v54, %v1223_v55 }
 0x9a1   : > { %1229 = vst.msk [vmem:[%s2044_s30] sm:$0xff] %vm448_vm2, %v1228_v56 }
 0x9a2   : > { %1733 = shalt.err (!%p1730_p12)
}
 0x9a3   : > { %s1734_s22 = scalar_lea.hbm %s2172_s25, 128  ;;  %s1738_s19 = scalar_lea.hbm %s2269_s14, 256 }
 0x9a4   : > { %p1735_p1 = scmp.ne.s32.totalorder %s2172_s25, %s1734_s22  ;;  %p1739_p10 = scmp.lt.u32.totalorder %s2172_s25, %s2269_s14 }
 0x9a5   : > { %p1740_p11 = scmp.lt.u32.totalorder %s1738_s19, %s1734_s22  ;;  %p1742_p0 = scmp.lt.u32.totalorder %s1734_s22, %s2172_s25 }
 0x9a6   : > { %p1736_p2 = pnand %p1735_p1, %p2270_p7 }
 0x9a7   : > { %p1741_p9 = por %p1740_p11, %p1739_p10 }
 0x9a8   : > { %p1737_p5 = pneg %p1736_p2 }
 0x9a9   : > { %p1743_p13 = por %p1742_p0, %p1741_p9 }
 0x9ab   : > { %p1744_p4 = pnand %p1743_p13, %p1737_p5 }
 0x9ad   : > { %1747 = shalt.err (!%p1744_p4)
}
 0x9ae   : > { %1567 = dma.vmem_to_hbm [thread:$0]  (%p2270_p7), %s2174_s20, 128, %s2172_s25, %s1231_s26  }
 0x9af PF: > { %s2271_s12 = sld [smem:[#allocation13_spill]]  ;;  %s2272_s21 = sld [smem:[#allocation8_spill]] }
 0x9b0   : > { %s2273_s23 = sld [smem:[#allocation16_spill]] }
 0x9b5   : > { %p1578_p6 = scmp.ge.s32.totalorder %s2271_s12, 2  ;;  %s1256_s15 = sand.u32 1, %s2272_s21  }
 0x9b6   : > { %p2274_p3 = scmp.ne.s32.totalorder %s2273_s23, 0  ;;  %s1257_s9 = scalar_lea.sflag [#allocation4], %s1256_s15 }
 0x9b8   : > { %p1574_p8 = pnand %p1578_p6, %p2274_p3 }
 0x9ba   : > { %1785 = dma.done.wait (!%p1574_p8), %s1257_s9, 128  }
 0x9bb   : > { %1787 = vsyncadd (!%p1574_p8), %s1257_s9, 4294967168  ;;  %s23_s8 = sadd.s32 1, %s2271_s12   ;;  %s2275_s24 = sld [smem:[#allocation9_spill]] }
 0x9bc   : > { %p20_p12 = scmp.ge.s32.totalorder %s23_s8, 6   ;;  %s2276_s25 = sld [smem:[#allocation10_spill]] }
 0x9bd   : > { %s2277_s26 = sld [smem:[#allocation17_spill]]  ;;  %s2278_s27 = sld [smem:[#allocation11_spill]] }
 0x9be   : > { %s2279_s28 = sld [smem:[#allocation12_spill]]  ;;  %s2280_s29 = sld [smem:[#allocation14_spill]] }
 0x9bf   : > { %s2281_s30 = sld [smem:[#allocation15_spill]]  ;;  %22 = sbr.rel (!%p20_p12) target bundleno = 10 (0xa), region = 115 }
 0x9c6   :  { %1262 = vsyncpa [#allocation3], 1 }
 0x9c7   :  { %1264 = vsyncpa [#allocation3 + $0x1], 1 }
 0x9c8   :  { %1265 = vsyncpa [#allocation4], 1 }
 0x9c9   :  { %1267 = vsyncpa [#allocation4 + $0x1], 1 }

</bundles_post_ra>
